<compile_context>
chip_gen: v5e
topology: v5e:2x2
jax: 0.10.0
libtpu: 0.0.40
codegen_flags: <defaults>
</compile_context>

<pallas_src>
import jax
import jax.numpy as jnp
from jax.experimental import pallas as pl
from jax.experimental.pallas import tpu as pltpu


def _scorer_kernel(x_ref, w_ref, b_ref, o_ref):
    # x_ref: (TM, H); w_ref: (H, 1); b_ref: (1,) f32 in SMEM; o_ref: (TM, 1)
    y = jnp.dot(x_ref[...], w_ref[...], preferred_element_type=jnp.float32)
    o_ref[...] = (y + b_ref[0]).astype(o_ref.dtype)


def sentence_scorer(features, weight, bias):
    """features: (B, S, H); weight: (1, H) (PyTorch Linear layout); bias: (1,)."""
    B, S, H = features.shape
    M = B * S

    x2d = features.reshape(M, H)                     # keep native dtype (bf16 ok)
    w = weight.reshape(H, 1).astype(features.dtype)  # (out=1) -> transpose is a reshape
    b = bias.reshape(1).astype(jnp.float32)          # scalar bias, lives in SMEM

    # --- M-tile selection -------------------------------------------------
    # VMEM accounting (binding case: v5e's 16 MiB default scoped VMEM, use
    # ~12 MiB to leave headroom). Everything is double-buffered by Pallas:
    #   x tile  : 2 * TM * H * itemsize
    #   weight  : 2 * H * 128 * itemsize   ((H,1) block lane-pads to 128)
    #   output  : 2 * TM * 128 * 4         ((TM,1) block lane-pads to 128)
    itemsize = jnp.dtype(x2d.dtype).itemsize
    w_bytes = 2 * H * 128 * itemsize
    budget = max(0, 12 * 1024 * 1024 - w_bytes)
    bytes_per_row = 2 * H * itemsize + 2 * 128 * 4
    tm = min(1024, max(8, budget // bytes_per_row))  # 1024-row cap: DMA sweet spot
    tm = max(8, (tm // 8) * 8)                       # sublane-aligned tile rows

    if M <= tm:
        tm = M                                       # single full-extent block
        m_pad = M
    else:
        m_pad = pl.cdiv(M, tm) * tm
        if m_pad != M:
            x2d = jnp.pad(x2d, ((0, m_pad - M), (0, 0)))

    out = pl.pallas_call(
        _scorer_kernel,
        out_shape=jax.ShapeDtypeStruct((m_pad, 1), features.dtype),
        grid_spec=pltpu.PrefetchScalarGridSpec(
            num_scalar_prefetch=0,
            grid=(m_pad // tm,),
            in_specs=[
                pl.BlockSpec((tm, H), lambda i: (i, 0)),      # streamed x tiles
                pl.BlockSpec((H, 1), lambda i: (0, 0)),       # W resident across grid
                pl.BlockSpec(memory_space=pltpu.SMEM),        # bias scalar in SMEM
            ],
            out_specs=pl.BlockSpec((tm, 1), lambda i: (i, 0)),
        ),
        compiler_params=pltpu.CompilerParams(
            dimension_semantics=("parallel",),                # shard M across TCs (v7x)
        ),
    )(x2d, w, b)

    return out[:M].reshape(B, S, 1)


if __name__ == "__main__":
    # Small shapes consistent with the module: batch=2, seq=8, hidden=32.
    B, S, H = 2, 8, 32
    key = jax.random.PRNGKey(0)
    k_x, k_w, k_b = jax.random.split(key, 3)

    features = jax.random.normal(k_x, (B, S, H), dtype=jnp.float32)
    # Deterministic parameter init (shapes from nn.Linear(hidden_size, 1)).
    weight = jax.random.normal(k_w, (1, H), dtype=jnp.float32) * 0.02
    bias = jax.random.normal(k_b, (1,), dtype=jnp.float32) * 0.02

    y = sentence_scorer(features, weight, bias)
    jax.block_until_ready(y)

    # Reference check in plain JAX (eval-mode dropout == identity).
    y_ref = features.reshape(B * S, H) @ weight.reshape(H, 1) + bias
    y_ref = y_ref.reshape(B, S, 1)
    assert y.shape == (B, S, 1)
    assert jnp.allclose(y, y_ref, atol=1e-5, rtol=1e-5)

    print("KERNEL_OK")
</pallas_src>

<mosaic_0001>
module attributes {stable_mosaic.version = 11 : i64} {
  func.func @_scorer_kernel(%arg0: i32, %arg1: memref<16x32xf32, #tpu.memory_space<vmem>>, %arg2: memref<32x1xf32, #tpu.memory_space<vmem>>, %arg3: memref<1xf32, #tpu.memory_space<smem>>, %arg4: memref<16x1xf32, #tpu.memory_space<vmem>>) attributes {dimension_semantics = [#tpu.dimension_semantics<parallel>], iteration_bounds = array<i64: 1>, scalar_prefetch = 0 : i64, scratch_operands = 0 : i64, tpu.core_type = #tpu.core_type<tc>, window_params = [{transform_indices = @transform_0, window_bounds = array<i64: 16, 32>}, {pipeline_mode = #tpu.pipeline_mode<synchronous>, transform_indices = @transform_1, window_bounds = array<i64: 32, 1>}, {transform_indices = @transform_2, window_bounds = array<i64: 1>}, {transform_indices = @transform_3, window_bounds = array<i64: 16, 1>}]} {
    %c0 = arith.constant 0 : index
    %c0_0 = arith.constant 0 : index
    %0 = vector.load %arg1[%c0, %c0_0] : memref<16x32xf32, #tpu.memory_space<vmem>>, vector<16x32xf32>
    %c0_1 = arith.constant 0 : index
    %c0_2 = arith.constant 0 : index
    %1 = vector.load %arg2[%c0_1, %c0_2] : memref<32x1xf32, #tpu.memory_space<vmem>>, vector<32x1xf32>
    %cst = arith.constant dense<0.000000e+00> : vector<16x1xf32>
    %2 = tpu.matmul %0, %1, %cst {dimension_numbers = #tpu.dot_dimension_numbers<[1], [0], [0], [1], [0, 0, 1, 1], [], []>} : vector<16x32xf32>, vector<32x1xf32>, vector<16x1xf32> -> vector<16x1xf32>
    %c0_3 = arith.constant 0 : index
    %3 = memref.load %arg3[%c0_3] : memref<1xf32, #tpu.memory_space<smem>>
    %4 = vector.broadcast %3 : f32 to vector<16x1xf32>
    %5 = arith.addf %2, %4 : vector<16x1xf32>
    %c0_4 = arith.constant 0 : index
    %c0_5 = arith.constant 0 : index
    %6 = vector.load %arg4[%c0_4, %c0_5] : memref<16x1xf32, #tpu.memory_space<vmem>>, vector<16x1xf32>
    tpu.vector_store %arg4[%c0_4, %c0_5], %5 {strides = array<i32>} : memref<16x1xf32, #tpu.memory_space<vmem>>, vector<16x1xf32>,
    return
  }
  func.func @transform_0(%arg0: i32) -> (i32, i32) {
    %c0_i32 = arith.constant 0 : i32
    %c0_i32_0 = arith.constant 0 : i32
    return %arg0, %c0_i32 : i32, i32
  }
  func.func @transform_1(%arg0: i32) -> (i32, i32) {
    %c0_i32 = arith.constant 0 : i32
    %c0_i32_0 = arith.constant 0 : i32
    %c0_i32_1 = arith.constant 0 : i32
    return %c0_i32, %c0_i32_0 : i32, i32
  }
  func.func @transform_2(%arg0: i32) -> i32 {
    %c0_i32 = arith.constant 0 : i32
    %c0_i32_0 = arith.constant 0 : i32
    return %c0_i32 : i32
  }
  func.func @transform_3(%arg0: i32) -> (i32, i32) {
    %c0_i32 = arith.constant 0 : i32
    %c0_i32_0 = arith.constant 0 : i32
    return %arg0, %c0_i32 : i32, i32
  }
}

</mosaic_0001>

<bundles_post_ra>
// kernel: tpu_custom_call.1
= control target key start
LH: loop header
LB: loop body
LE: loop exit
PB: predicated region body
PF: predicated region fallthrough
CT: control target
= control target key end

     0   :  { %vm23_vm0 = vcmask 261120   ;;  %vm53_vm1 = vcmask 7168   ;;  %s113_s1 = inlined_call_operand.vmem [shape: f32[32,1], index: 1, kind: input, shape index: {}]   ;;  %s114_s0 = inlined_call_operand.vmem [shape: f32[16,32], index: 0, kind: input, shape index: {}]   ;;  %s115_s2 = inlined_call_operand.<no memory space> [shape: f32[1], index: 2, kind: input, shape index: {}]   ;;  %s116_s3 = inlined_call_operand.vmem [shape: f32[16,1], index: 3, kind: output, shape index: {}]  }
   0x1   :  { %v20_v0 = vld [vmem:[%s113_s1 + $0x18] sm:$0xff]  ;;  %v19_v1 = vld [vmem:[%s113_s1 + $0x10] sm:$0xff]  ;;  %v18_v2 = vld [vmem:[%s113_s1 + $0x8] sm:$0xff]  ;;  %v22_v6 = vstv %s115_s2 }
   0x2   :  { %42 = vmatpush.msra.mxu0 %v20_v0  ;;  %62 = vmatpush.msra.mxu1 %v20_v0  ;;  %v17_v3 = vld [vmem:[%s113_s1] sm:$0xff]  ;;  %v16_v5 = vld [vmem:[%s114_s0 + $0x8] sm:$0xff] }
   0x3   :  { %v15_v4 = vld [vmem:[%s114_s0] sm:$0xff] }
   0x4   :  { %43 = vmatpush.msra.mxu0 %v19_v1  ;;  %63 = vmatpush.msra.mxu1 %v19_v1 }
   0x6   :  { %44 = vmatpush.msra.mxu0 %v18_v2  ;;  %64 = vmatpush.msra.mxu1 %v18_v2 }
   0x8   :  { %45 = vmatpush.msra.mxu0 %v17_v3  ;;  %65 = vmatpush.msra.mxu1 %v17_v3 }
   0x9   :  { %60 = vmatmul.msk.f32.vlgmr.msra.gmra.mxu0 %vm23_vm0, %v15_v4  ;;  %61 = vmatmul.msk.f32.vlgmr.msra.gmra.mxu1 %vm23_vm0, %v16_v5 }
  0x86   :  { %v47_v7 = vpop.f32.mrf.mxu0  ;;  %v50_v8 = vpop.f32.mrf.mxu1 }
  0x87   :  { %v48_v9 = vadd.f32 %v47_v7, %v22_v6  ;;  %v51_v10 = vadd.f32 %v50_v8, %v22_v6 }
  0x89   :  { %54 = vst.msk [vmem:[%s116_s3] sm:$0xff] %vm53_vm1, %v48_v9 }
  0x8a   :  { %55 = vst.msk [vmem:[%s116_s3 + $0x8] sm:$0xff] %vm53_vm1, %v51_v10 }

</bundles_post_ra>
